<compile_context>
chip_gen: v5e
topology: v5e:2x2
jax: 0.10.0
libtpu: 0.0.40
codegen_flags: <defaults>
</compile_context>

<pallas_src>
import jax
import jax.numpy as jnp
from jax.experimental import pallas as pl
from jax.experimental.pallas import tpu as pltpu


# ----------------------------------------------------------------------------
# Kernel
# ----------------------------------------------------------------------------
def _se_kernel(x_ref, w1t_ref, w2_ref, o_ref):
    # x_ref : (Bb, C, HW)  Bb batch rows, channels on sublanes, spatial on lanes
    # w1t_ref: (C, hid)    == fc1.weight.T   (fc1: Linear(C -> hid, bias=False))
    # w2_ref : (C, hid)    == fc2.weight     (fc2: Linear(hid -> C, bias=False))
    # o_ref : (Bb, C, HW)

    # Global average pool over spatial positions (lane reduce), accumulated in
    # f32 regardless of the input dtype (keeps bf16 inputs accurate).
    g = jnp.mean(x_ref[...].astype(jnp.float32), axis=2)          # (Bb, C)

    # Squeeze/excite MLP, batched over the Bb rows (tiny matmuls, f32 accum).
    h = jnp.maximum(
        jnp.dot(g, w1t_ref[...], preferred_element_type=jnp.float32), 0.0
    )                                                              # (Bb, hid)
    s = jax.nn.sigmoid(
        jnp.dot(h, w2_ref[...].T, preferred_element_type=jnp.float32)
    )                                                              # (Bb, C)

    # Channel re-weighting; re-read x_ref (don't hold the big tile live across
    # the MLP chain), multiply in f32, store in the output's native dtype.
    o_ref[...] = (
        x_ref[...].astype(jnp.float32) * s[:, :, None]
    ).astype(o_ref.dtype)


# ----------------------------------------------------------------------------
# Wrapper (NCHW in, NCHW out — matches the PyTorch module; the (B,C,H,W) ->
# (B,C,H*W) reshape is a free contiguous view, no transpose needed)
# ----------------------------------------------------------------------------
def _pick_batch_block(B, C, HW, itemsize, budget_bytes=12 * 1024 * 1024):
    # Double-buffered input + output blocks: ~4 * Bb * C * HW * itemsize bytes.
    per_b = 4 * C * HW * itemsize
    bb = budget_bytes // max(per_b, 1)
    return int(max(1, min(B, bb, 64)))


def se_block_forward(params, x_nchw):
    B, C, H, W = x_nchw.shape
    HW = H * W
    x = x_nchw.reshape(B, C, HW)                     # keep native dtype (no f32 cast)
    w1t = params["w1t"].astype(jnp.float32)          # (C, hid)
    w2 = params["w2"].astype(jnp.float32)            # (C, hid)
    hid = w1t.shape[1]

    Bb = _pick_batch_block(B, C, HW, x.dtype.itemsize)
    grid = (pl.cdiv(B, Bb),)

    out = pl.pallas_call(
        _se_kernel,
        out_shape=jax.ShapeDtypeStruct((B, C, HW), x.dtype),
        grid=grid,
        in_specs=[
            pl.BlockSpec((Bb, C, HW), lambda b: (b, 0, 0)),   # batched x block
            pl.BlockSpec((C, hid), lambda b: (0, 0)),         # weights: constant block
            pl.BlockSpec((C, hid), lambda b: (0, 0)),
        ],
        out_specs=pl.BlockSpec((Bb, C, HW), lambda b: (b, 0, 0)),
        compiler_params=pltpu.CompilerParams(
            dimension_semantics=("parallel",),                # shard grid over TCs (v7x)
            vmem_limit_bytes=32 * 1024 * 1024,                # v5e default is only ~16 MiB
        ),
    )(x, w1t, w2)
    return out.reshape(B, C, H, W)

# TODO(synk): if reused with HW not a multiple of 128 (e.g. 14x14, 7x7), switch
# to a lane-dense layout on C (or fold channels into lanes) to avoid masked vst.


# ----------------------------------------------------------------------------
# Pure-JAX reference (mirrors the PyTorch forward) and synthetic init
# ----------------------------------------------------------------------------
def se_block_reference(params, x):
    y = jnp.mean(x.astype(jnp.float32), axis=(2, 3))           # AdaptiveAvgPool2d((1,1))
    y = jnp.maximum(y @ params["w1t"], 0.0)                    # Linear + ReLU
    y = jax.nn.sigmoid(y @ params["w2"].T)                     # Linear + Sigmoid
    return (x.astype(jnp.float32) * y[:, :, None, None]).astype(x.dtype)


def init_params(key, in_channels, ratio=16):
    hid = in_channels // ratio
    k1, k2 = jax.random.split(key)
    # nn.init.normal_(weight, 0, 0.01) as in the PyTorch module.
    w1 = 0.01 * jax.random.normal(k1, (hid, in_channels), jnp.float32)  # fc1.weight
    w2 = 0.01 * jax.random.normal(k2, (in_channels, hid), jnp.float32)  # fc2.weight
    return {"w1t": w1.T, "w2": w2}


if __name__ == "__main__":
    B, C, H, W = 2, 64, 16, 16
    ratio = 16

    key = jax.random.PRNGKey(0)
    kx, kp = jax.random.split(key)
    x = jax.random.normal(kx, (B, C, H, W), jnp.float32)      # NCHW input
    params = init_params(kp, C, ratio)

    fwd = jax.jit(se_block_forward)
    out = jax.block_until_ready(fwd(params, x))

    ref = se_block_reference(params, x)
    assert out.shape == (B, C, H, W), out.shape
    assert out.dtype == x.dtype, out.dtype
    assert bool(jnp.all(jnp.isfinite(out)))
    assert bool(jnp.allclose(out, ref, rtol=1e-4, atol=1e-4)), float(
        jnp.max(jnp.abs(out - ref)))
    print("KERNEL_OK")
</pallas_src>

<mosaic_0001>
module attributes {stable_mosaic.version = 11 : i64} {
  func.func @_se_kernel(%arg0: i32, %arg1: memref<2x64x256xf32, #tpu.memory_space<vmem>>, %arg2: memref<64x4xf32, #tpu.memory_space<vmem>>, %arg3: memref<64x4xf32, #tpu.memory_space<vmem>>, %arg4: memref<2x64x256xf32, #tpu.memory_space<vmem>>) attributes {dimension_semantics = [#tpu.dimension_semantics<parallel>], iteration_bounds = array<i64: 1>, scalar_prefetch = 0 : i64, scratch_operands = 0 : i64, tpu.core_type = #tpu.core_type<tc>, window_params = [{transform_indices = @transform_0, window_bounds = array<i64: 2, 64, 256>}, {pipeline_mode = #tpu.pipeline_mode<synchronous>, transform_indices = @transform_1, window_bounds = array<i64: 64, 4>}, {pipeline_mode = #tpu.pipeline_mode<synchronous>, transform_indices = @transform_2, window_bounds = array<i64: 64, 4>}, {transform_indices = @transform_3, window_bounds = array<i64: 2, 64, 256>}]} {
    %c0 = arith.constant 0 : index
    %c0_0 = arith.constant 0 : index
    %c0_1 = arith.constant 0 : index
    %0 = vector.load %arg1[%c0, %c0_0, %c0_1] : memref<2x64x256xf32, #tpu.memory_space<vmem>>, vector<2x64x256xf32>
    %cst = arith.constant dense<0.000000e+00> : vector<2x64xf32>
    %1 = vector.multi_reduction <add>, %0, %cst [2] : vector<2x64x256xf32> to vector<2x64xf32>
    %cst_2 = arith.constant 2.560000e+02 : f32
    %2 = vector.broadcast %cst_2 : f32 to vector<2x64xf32>
    %3 = arith.divf %1, %2 : vector<2x64xf32>
    %c0_3 = arith.constant 0 : index
    %c0_4 = arith.constant 0 : index
    %4 = vector.load %arg2[%c0_3, %c0_4] : memref<64x4xf32, #tpu.memory_space<vmem>>, vector<64x4xf32>
    %cst_5 = arith.constant dense<0.000000e+00> : vector<2x4xf32>
    %5 = tpu.matmul %3, %4, %cst_5 {dimension_numbers = #tpu.dot_dimension_numbers<[1], [0], [0], [1], [0, 0, 1, 1], [], []>} : vector<2x64xf32>, vector<64x4xf32>, vector<2x4xf32> -> vector<2x4xf32>
    %cst_6 = arith.constant 0.000000e+00 : f32
    %6 = vector.broadcast %cst_6 : f32 to vector<2x4xf32>
    %7 = arith.maximumf %5, %6 : vector<2x4xf32>
    %c0_7 = arith.constant 0 : index
    %c0_8 = arith.constant 0 : index
    %8 = vector.load %arg3[%c0_7, %c0_8] : memref<64x4xf32, #tpu.memory_space<vmem>>, vector<64x4xf32>
    %9 = tpu.transpose %8, [1, 0] : vector<64x4xf32> -> vector<4x64xf32>
    %cst_9 = arith.constant dense<0.000000e+00> : vector<2x64xf32>
    %10 = tpu.matmul %7, %9, %cst_9 {dimension_numbers = #tpu.dot_dimension_numbers<[1], [0], [0], [1], [0, 0, 1, 1], [], []>} : vector<2x4xf32>, vector<4x64xf32>, vector<2x64xf32> -> vector<2x64xf32>
    %11 = arith.negf %10 : vector<2x64xf32>
    %12 = math.exp %11 : vector<2x64xf32>
    %cst_10 = arith.constant 1.000000e+00 : f32
    %13 = vector.broadcast %cst_10 : f32 to vector<2x64xf32>
    %14 = arith.addf %13, %12 : vector<2x64xf32>
    %15 = arith.divf %13, %14 : vector<2x64xf32>
    %c0_11 = arith.constant 0 : index
    %c0_12 = arith.constant 0 : index
    %c0_13 = arith.constant 0 : index
    %16 = vector.load %arg1[%c0_11, %c0_12, %c0_13] : memref<2x64x256xf32, #tpu.memory_space<vmem>>, vector<2x64x256xf32>
    %17 = vector.shape_cast %15 : vector<2x64xf32> to vector<2x64x1xf32>
    %18 = vector.broadcast %17 : vector<2x64x1xf32> to vector<2x64x256xf32>
    %19 = arith.mulf %16, %18 : vector<2x64x256xf32>
    %c0_14 = arith.constant 0 : index
    %c0_15 = arith.constant 0 : index
    %c0_16 = arith.constant 0 : index
    %20 = vector.load %arg4[%c0_14, %c0_15, %c0_16] : memref<2x64x256xf32, #tpu.memory_space<vmem>>, vector<2x64x256xf32>
    tpu.vector_store %arg4[%c0_14, %c0_15, %c0_16], %19 {strides = array<i32>} : memref<2x64x256xf32, #tpu.memory_space<vmem>>, vector<2x64x256xf32>,
    return
  }
  func.func @transform_0(%arg0: i32) -> (i32, i32, i32) {
    %c0_i32 = arith.constant 0 : i32
    %c0_i32_0 = arith.constant 0 : i32
    %c0_i32_1 = arith.constant 0 : i32
    return %arg0, %c0_i32, %c0_i32_0 : i32, i32, i32
  }
  func.func @transform_1(%arg0: i32) -> (i32, i32) {
    %c0_i32 = arith.constant 0 : i32
    %c0_i32_0 = arith.constant 0 : i32
    %c0_i32_1 = arith.constant 0 : i32
    return %c0_i32, %c0_i32_0 : i32, i32
  }
  func.func @transform_2(%arg0: i32) -> (i32, i32) {
    %c0_i32 = arith.constant 0 : i32
    %c0_i32_0 = arith.constant 0 : i32
    %c0_i32_1 = arith.constant 0 : i32
    return %c0_i32, %c0_i32_0 : i32, i32
  }
  func.func @transform_3(%arg0: i32) -> (i32, i32, i32) {
    %c0_i32 = arith.constant 0 : i32
    %c0_i32_0 = arith.constant 0 : i32
    %c0_i32_1 = arith.constant 0 : i32
    return %arg0, %c0_i32, %c0_i32_0 : i32, i32, i32
  }
}

</mosaic_0001>

<bundles_post_ra>
// kernel: se_block_forward.1
= control target key start
LH: loop header
LB: loop body
LE: loop exit
PB: predicated region body
PF: predicated region fallthrough
CT: control target
= control target key end

     0   :  { %v489_v49 = vmov 256.0   ;;  %vm221_vm0 = vcmask 31744   ;;  %vm146_vm2 = vcmask 130112   ;;  %vm150_vm3 = vcmask 195712   ;;  %s915_s0 = inlined_call_operand.vmem [shape: f32[2,64,256], index: 0, kind: input, shape index: {}]   ;;  %s916_s1 = inlined_call_operand.vmem [shape: f32[64,4], index: 1, kind: input, shape index: {}]   ;;  %s917_s2 = inlined_call_operand.vmem [shape: f32[64,4], index: 2, kind: input, shape index: {}]   ;;  %s918_s3 = inlined_call_operand.vmem [shape: f32[2,64,256], index: 3, kind: output, shape index: {}]  }
   0x1   :  { %v513_v0 = vld [vmem:[%s915_s0 + $0x80] sm:$0xff]  ;;  %v518_v1 = vld [vmem:[%s915_s0 + $0x88] sm:$0xff]  ;;  %v549_v9 = vld [vmem:[%s915_s0 + $0x90] sm:$0xff]  ;;  %483 = vrcp.f32 %v489_v49  ;;  %vm154_vm4 = vcmask 261312   ;;  %vm158_vm5 = vcmask 326912   ;;  %vm162_vm6 = vcmask 392512  }
   0x2   :  { %v523_v2 = vld [vmem:[%s915_s0] sm:$0xff]  ;;  %v70_v3 = vadd.f32 %v518_v1, %v513_v0  ;;  %v530_v4 = vld [vmem:[%s915_s0 + $0x8] sm:$0xff]  ;;  %v554_v10 = vld [vmem:[%s915_s0 + $0x98] sm:$0xff]  ;;  %vm166_vm7 = vcmask 458112   ;;  %vm170_vm8 = vcmask 523712   ;;  %vm187_vm9 = vcmask 1041409  }
   0x3   :  { %v535_v5 = vld [vmem:[%s915_s0 + $0x20] sm:$0xff]  ;;  %v540_v6 = vld [vmem:[%s915_s0 + $0x28] sm:$0xff]  ;;  %v46_v7 = vadd.f32 %v530_v4, %v523_v2  ;;  %v559_v11 = vld [vmem:[%s915_s0 + $0x10] sm:$0xff]  ;;  %v73_v15 = vadd.f32 %v554_v10, %v549_v9  ;;  %vm189_vm10 = vcmask 523264  }
   0x4   :  { %v52_v8 = vadd.f32 %v540_v6, %v535_v5  ;;  %71 = vadd.xlane.f32.xlu1 %v70_v3  ;;  %v564_v12 = vld [vmem:[%s915_s0 + $0x18] sm:$0xff]  ;;  %v569_v13 = vld [vmem:[%s915_s0 + $0xa0] sm:$0xff]  ;;  %v574_v14 = vld [vmem:[%s915_s0 + $0xa8] sm:$0xff] }
   0x5   :  { %47 = vadd.xlane.f32.xlu0 %v46_v7  ;;  %v49_v16 = vadd.f32 %v564_v12, %v559_v11  ;;  %v76_v17 = vadd.f32 %v574_v14, %v569_v13  ;;  %v585_v18 = vld [vmem:[%s915_s0 + $0xb0] sm:$0xff]  ;;  %v590_v19 = vld [vmem:[%s915_s0 + $0xb8] sm:$0xff]  ;;  %v605_v22 = vld [vmem:[%s915_s0 + $0x40] sm:$0xff] }
   0x6   :  { %53 = vadd.xlane.f32.xlu2 %v52_v8  ;;  %v595_v20 = vld [vmem:[%s915_s0 + $0x30] sm:$0xff]  ;;  %v600_v21 = vld [vmem:[%s915_s0 + $0x38] sm:$0xff]  ;;  %v610_v23 = vld [vmem:[%s915_s0 + $0x48] sm:$0xff]  ;;  %v79_v24 = vadd.f32 %v590_v19, %v585_v18 }
   0x7   :  { %v55_v25 = vadd.f32 %v600_v21, %v595_v20  ;;  %v58_v26 = vadd.f32 %v610_v23, %v605_v22  ;;  %v621_v27 = vld [vmem:[%s915_s0 + $0x50] sm:$0xff]  ;;  %v626_v28 = vld [vmem:[%s915_s0 + $0x58] sm:$0xff]  ;;  %v631_v29 = vld [vmem:[%s915_s0 + $0xc0] sm:$0xff]  ;;  %v484_v56 = vpop.eup %483 }
   0x8   :  { %v636_v30 = vld [vmem:[%s915_s0 + $0xc8] sm:$0xff]  ;;  %v641_v31 = vld [vmem:[%s915_s0 + $0xd0] sm:$0xff]  ;;  %v646_v32 = vld [vmem:[%s915_s0 + $0xd8] sm:$0xff]  ;;  %v61_v33 = vadd.f32 %v626_v28, %v621_v27  ;;  %v95_v59 = vmul.f32 256.0, %v484_v56  ;;  %vm99_vm1 = vweird.f32 %v484_v56 }
   0x9   :  { %v82_v34 = vadd.f32 %v636_v30, %v631_v29  ;;  %v85_v35 = vadd.f32 %v646_v32, %v641_v31  ;;  %v657_v36 = vld [vmem:[%s915_s0 + $0xe0] sm:$0xff]  ;;  %v662_v37 = vld [vmem:[%s915_s0 + $0xe8] sm:$0xff]  ;;  %v677_v40 = vld [vmem:[%s915_s0 + $0x70] sm:$0xff] }
   0xa   :  { %v667_v38 = vld [vmem:[%s915_s0 + $0x60] sm:$0xff]  ;;  %v672_v39 = vld [vmem:[%s915_s0 + $0x68] sm:$0xff]  ;;  %v682_v41 = vld [vmem:[%s915_s0 + $0x78] sm:$0xff]  ;;  %v88_v42 = vadd.f32 %v662_v37, %v657_v36  ;;  %v96_v7 = vsub.f32 1.0, %v95_v59 }
   0xb   :  { %v64_v43 = vadd.f32 %v672_v39, %v667_v38  ;;  %v67_v44 = vadd.f32 %v682_v41, %v677_v40  ;;  %v693_v45 = vld [vmem:[%s915_s0 + $0xf0] sm:$0xff]  ;;  %v698_v46 = vld [vmem:[%s915_s0 + $0xf8] sm:$0xff]  ;;  %v122_v54 = vld [vmem:[%s916_s1 + $0x28] sm:$0xff] }
   0xc   :  { %74 = vadd.xlane.f32.xlu1 %v73_v15  ;;  %v91_v47 = vadd.f32 %v698_v46, %v693_v45  ;;  %v124_v48 = vld [vmem:[%s916_s1 + $0x38] sm:$0xff]  ;;  %v123_v53 = vld [vmem:[%s916_s1 + $0x30] sm:$0xff]  ;;  %v121_v55 = vld [vmem:[%s916_s1 + $0x20] sm:$0xff] }
   0xd   :  { %50 = vadd.xlane.f32.xlu0 %v49_v16  ;;  %200 = vmatpush.msra.mxu0 %v124_v48  ;;  %v120_v57 = vld [vmem:[%s916_s1 + $0x18] sm:$0xff]  ;;  %v119_v62 = vld [vmem:[%s916_s1 + $0x10] sm:$0xff]  ;;  %v118_v63 = vld [vmem:[%s916_s1 + $0x8] sm:$0xff]  ;;  %v97_v16 = vmul.f32 %v484_v56, %v96_v7 }
   0xe   :  { %77 = vadd.xlane.f32.xlu2 %v76_v17  ;;  %v117_v3 = vld [vmem:[%s916_s1] sm:$0xff]  ;;  %v220_v15 = vld [vmem:[%s917_s2 + $0x38] sm:$0xff] }
   0xf   :  { %201 = vmatpush.msra.mxu0 %v123_v53  ;;  %455 = vmatpush.xpose.msk.msra.mxu1 %vm221_vm0, %v220_v15  ;;  %v217_v53 = vld [vmem:[%s917_s2 + $0x20] sm:$0xff] }
  0x11   :  { %202 = vmatpush.msra.mxu0 %v122_v54 }
  0x13   :  { %203 = vmatpush.msra.mxu0 %v121_v55 }
  0x14   :  { %80 = vadd.xlane.f32.xlu1 %v79_v24 }
  0x15   :  { %56 = vadd.xlane.f32.xlu0 %v55_v25  ;;  %204 = vmatpush.msra.mxu0 %v120_v57  ;;  %v219_v25 = vld [vmem:[%s917_s2 + $0x30] sm:$0xff] }
  0x16   :  { %59 = vadd.xlane.f32.xlu2 %v58_v26  ;;  %v919_v26 = vlaneseq  ;;  %456 = vmatpush.xpose.msk.msra.mxu1 %vm221_vm0, %v219_v25 }
  0x17   :  { %205 = vmatpush.msra.mxu0 %v119_v62 }
  0x19   :  { %206 = vmatpush.msra.mxu0 %v118_v63 }
  0x1b   :  { %207 = vmatpush.msra.mxu0 %v117_v3 }
  0x1c   :  { %62 = vadd.xlane.f32.xlu1 %v61_v33  ;;  %v98_v33 = vadd.f32 %v484_v56, %v97_v16 }
  0x1d   :  { %83 = vadd.xlane.f32.xlu0 %v82_v34  ;;  %v218_v34 = vld [vmem:[%s917_s2 + $0x28] sm:$0xff] }
  0x1e   :  { %86 = vadd.xlane.f32.xlu2 %v85_v35  ;;  %v142_v35 = vand.u32 127, %v919_v26  ;;  %457 = vmatpush.xpose.msk.msra.mxu1 %vm221_vm0, %v218_v34 }
  0x20   :  { %v144_v48 = vadd.s32 4294967288, %v142_v35  ;;  %v148_v59 = vadd.s32 4294967280, %v142_v35  ;;  %v152_v63 = vadd.s32 4294967272, %v142_v35  ;;  %v156_v16 = vadd.s32 4294967264, %v142_v35 }
  0x21   :  { %v168_v26 = vadd.s32 4294967240, %v142_v35 }
  0x22   :  { %458 = vmatpush.xpose.msk.msra.mxu1 %vm221_vm0, %v217_v53  ;;  %v160_v53 = vadd.s32 4294967256, %v142_v35 }
  0x24   :  { %89 = vadd.xlane.f32.xlu1 %v88_v42 }
  0x25   :  { %65 = vadd.xlane.f32.xlu0 %v64_v43  ;;  %v738_v43 = vsel %vm99_vm1, %v484_v56, %v98_v33 }
  0x26   :  { %68 = vadd.xlane.f32.xlu2 %v67_v44 }
  0x2d   :  { %92 = vadd.xlane.f32.xlu0 %v91_v47 }
  0x77   :  { %v72_v50 = vpop.xlane.xlu1 %71 }
  0x78   :  { %v48_v51 = vpop.xlane.xlu0 %47  ;;  %v109_v54 = vmul.f32 %v738_v43, %v72_v50 }
  0x79   :  { %v54_v52 = vpop.xlane.xlu2 %53  ;;  %v101_v55 = vmul.f32 %v738_v43, %v48_v51 }
  0x7a   :  { %v103_v56 = vmul.f32 %v738_v43, %v54_v52  ;;  %v172_v51 = vperm.slane %v109_v54, %v142_v35 }
  0x7b   :  { %v143_v7 = vperm.slane %v101_v55, %v142_v35  ;;  %v164_v55 = vadd.s32 4294967248, %v142_v35 }
  0x7c   :  { %v149_v52 = vperm.slane %v103_v56, %v148_v59 }
  0x7f   :  { %v75_v58 = vpop.xlane.xlu1 %74 }
  0x80   :  { %v51_v60 = vpop.xlane.xlu0 %50  ;;  %v110_v57 = vmul.f32 %v738_v43, %v75_v58 }
  0x81   :  { %v78_v61 = vpop.xlane.xlu2 %77  ;;  %v102_v49 = vmul.f32 %v738_v43, %v51_v60  ;;  %v216_v60 = vld [vmem:[%s917_s2 + $0x18] sm:$0xff] }
  0x82   :  { %v111_v50 = vmul.f32 %v738_v43, %v78_v61  ;;  %v173_v58 = vperm.slane %v110_v57, %v144_v48  ;;  %459 = vmatpush.xpose.msk.msra.mxu1 %vm221_vm0, %v216_v60 }
  0x83   :  { %v145_v62 = vperm.slane %v102_v49, %v144_v48 }
  0x84   :  { %v175_v48 = vperm.slane %v111_v50, %v148_v59  ;;  %v174_v57 = vsel %vm146_vm2, %v173_v58, %v172_v51 }
  0x85   :  { %v147_v34 = vsel %vm146_vm2, %v145_v62, %v143_v7 }
  0x87   :  { %v81_v8 = vpop.xlane.xlu1 %80 }
  0x88   :  { %v57_v17 = vpop.xlane.xlu0 %56  ;;  %v112_v15 = vmul.f32 %v738_v43, %v81_v8  ;;  %v215_v8 = vld [vmem:[%s917_s2 + $0x10] sm:$0xff] }
  0x89   :  { %v60_v24 = vpop.xlane.xlu2 %59  ;;  %v104_v3 = vmul.f32 %v738_v43, %v57_v17  ;;  %460 = vmatpush.xpose.msk.msra.mxu1 %vm221_vm0, %v215_v8 }
  0x8a   :  { %v105_v25 = vmul.f32 %v738_v43, %v60_v24  ;;  %v177_v56 = vperm.slane %v112_v15, %v152_v63 }
  0x8b   :  { %v153_v49 = vperm.slane %v104_v3, %v152_v63  ;;  %v151_v3 = vsel %vm150_vm3, %v149_v52, %v147_v34  ;;  %v214_v63 = vld [vmem:[%s917_s2 + $0x8] sm:$0xff] }
  0x8d   :  { %v155_v59 = vsel %vm154_vm4, %v153_v49, %v151_v3  ;;  %461 = vmatpush.xpose.msk.msra.mxu1 %vm221_vm0, %v214_v63 }
  0x8f   :  { %v63_v42 = vpop.xlane.xlu1 %62 }
  0x90   :  { %v84_v44 = vpop.xlane.xlu0 %83  ;;  %v106_v61 = vmul.f32 %v738_v43, %v63_v42  ;;  %v157_v42 = vperm.slane %v105_v25, %v156_v16 }
  0x91   :  { %v87_v47 = vpop.xlane.xlu2 %86  ;;  %v113_v33 = vmul.f32 %v738_v43, %v84_v44 }
  0x92   :  { %v114_v62 = vmul.f32 %v738_v43, %v87_v47  ;;  %v161_v50 = vperm.slane %v106_v61, %v160_v53  ;;  %v176_v47 = vsel %vm150_vm3, %v175_v48, %v174_v57  ;;  %v159_v52 = vsel %vm158_vm5, %v157_v42, %v155_v59 }
  0x93   :  { %v179_v60 = vperm.slane %v113_v33, %v156_v16  ;;  %v178_v58 = vsel %vm154_vm4, %v177_v56, %v176_v47 }
  0x94   :  { %v181_v15 = vperm.slane %v114_v62, %v160_v53  ;;  %v163_v33 = vsel %vm162_vm6, %v161_v50, %v159_v52 }
  0x95   :  { %v180_v16 = vsel %vm158_vm5, %v179_v60, %v178_v58 }
  0x97   :  { %v90_v54 = vpop.xlane.xlu1 %89 }
  0x98   :  { %v66_v17 = vpop.xlane.xlu0 %65  ;;  %v115_v7 = vmul.f32 %v738_v43, %v90_v54  ;;  %v182_v54 = vsel %vm162_vm6, %v181_v15, %v180_v16 }
  0x99   :  { %v107_v24 = vmul.f32 %v738_v43, %v66_v17  ;;  %v69_v44 = vpop.xlane.xlu2 %68 }
  0x9a   :  { %v108_v17 = vmul.f32 %v738_v43, %v69_v44  ;;  %v183_v25 = vperm.slane %v115_v7, %v164_v55 }
  0x9b   :  { %v165_v51 = vperm.slane %v107_v24, %v164_v55  ;;  %v213_v55 = vld [vmem:[%s917_s2] sm:$0xff] }
  0x9c   :  { %v169_v34 = vperm.slane %v108_v17, %v168_v26  ;;  %v184_v48 = vsel %vm166_vm7, %v183_v25, %v182_v54  ;;  %462 = vmatpush.xpose.msk.msra.mxu1 %vm221_vm0, %v213_v55 }
  0x9d   :  { %v167_v61 = vsel %vm166_vm7, %v165_v51, %v163_v33 }
  0x9e   :  { %v171_v53 = vsel %vm170_vm8, %v169_v34, %v167_v61 }
  0xa0   :  { %v93_v35 = vpop.xlane.xlu0 %92 }
  0xa1   :  { %v116_v49 = vmul.f32 %v738_v43, %v93_v35  ;;  %v920_v43 = vlaneseq }
  0xa3   :  { %v185_v8 = vperm.slane %v116_v49, %v168_v26  ;;  %v290_v62 = vshrl.u32 %v920_v43, 7 }
  0xa5   :  { %v186_v24 = vsel %vm170_vm8, %v185_v8, %v184_v48  ;;  %466 = vset.pattern.permute.xlu1 %v290_v62  ;;  %v303_v26 = vadd.s32 16, %v290_v62  ;;  %v297_v3 = vadd.s32 8, %v290_v62  ;;  %v309_v33 = vadd.s32 24, %v290_v62 }
  0xa6   :  { %v188_v44 = vsel %vm187_vm9, %v186_v24, %v171_v53  ;;  %v315_v34 = vadd.s32 32, %v290_v62  ;;  %v327_v61 = vadd.s32 48, %v290_v62  ;;  %v321_v54 = vadd.s32 40, %v290_v62 }
  0xa7   :  { %454 = vmatmul.msk.f32.vlgmr.msra.gmra.mxu0 %vm189_vm10, %v188_v44  ;;  %468 = vset.pattern.permute.xlu0 %v303_v26  ;;  %v333_v8 = vadd.s32 56, %v290_v62 }
  0xa8   :  { %467 = vset.pattern.permute.xlu2 %v297_v3 }
 0x124   :  { %v209_v57 = vpop.f32.mrf.mxu0 }
 0x125   :  { %v212_v56 = vmax.f32 %v209_v57, 0.0 }
 0x127   :  { %463 = vmatmul.msk.f32.vlgmr.msra.gmra.mxu1 %vm221_vm0, %v212_v56 }
 0x1a4   :  { %v266_v42 = vpop.f32.mrf.mxu1 }
 0x1a5   :  { %v464_v60 = vmul.f32 -1.442695, %v266_v42 }
 0x1a7   :  { %485 = vpow2.f32 %v464_v60 }
 0x1ad   :  { %v486_v7 = vpop.eup %485 }
 0x1ae   :  { %v272_v59 = vadd.f32 1.0, %v486_v7 }
 0x1b0   :  { %487 = vrcp.f32 %v272_v59  ;;  %v284_v47 = vand.u32 2147483648, %v272_v59  ;;  %v282_v58 = vand.u32 2147483647, %v272_v59  ;;  %vm278_vm12 = vweird.f32 %v272_v59 }
 0x1b2   :  { %v285_v52 = vor.u32 1.1754944e-38, %v284_v47  ;;  %vm283_vm14 = vcmp.eq.f32.partialorder %v282_v58, 8.507059e+37 }
 0x1b6   :  { %v488_v50 = vpop.eup %487 }
 0x1b7   :  { %v274_v17 = vmul.f32 %v488_v50, %v272_v59  ;;  %vm279_vm11 = vweird.f32 %v488_v50 }
 0x1b8   :  { %vm280_vm13 = vmor %vm278_vm12, %vm279_vm11 }
 0x1b9   :  { %v275_v63 = vsub.f32 1.0, %v274_v17 }
 0x1bb   :  { %v276_v51 = vmul.f32 %v488_v50, %v275_v63 }
 0x1bd   :  { %v277_v15 = vadd.f32 %v488_v50, %v276_v51 }
 0x1bf   :  { %v281_v16 = vsel %vm280_vm13, %v488_v50, %v277_v15 }
 0x1c0   :  { %v286_v25 = vsel %vm283_vm14, %v285_v52, %v281_v16 }
 0x1c1   :  { %v288_v35 = vperm.slane %v286_v25, 0  ;;  %v337_v49 = vperm.slane %v286_v25, 1 }
 0x1c3   :  { %305 = vperm.xlu0 %468, %v288_v35   ;;  %299 = vperm.xlu2 %467, %v288_v35  }
 0x1c4   :  { %293 = vperm.xlu1 %466, %v288_v35  }
 0x1cb   :  { %475 = vset.pattern.permute.xlu0 %v297_v3  ;;  %469 = vset.pattern.permute.xlu2 %v309_v33 }
 0x1cc   :  { %470 = vset.pattern.permute.xlu1 %v315_v34 }
 0x1d3   :  { %348 = vperm.xlu0 %475, %v337_v49   ;;  %311 = vperm.xlu2 %469, %v288_v35  }
 0x1d4   :  { %317 = vperm.xlu1 %470, %v288_v35  }
 0x1db   :  { %480 = vset.pattern.permute.xlu0 %v327_v61  ;;  %471 = vset.pattern.permute.xlu2 %v321_v54 }
 0x1dc   :  { %472 = vset.pattern.permute.xlu1 %v327_v61 }
 0x1e3   :  { %378 = vperm.xlu0 %480, %v337_v49   ;;  %323 = vperm.xlu2 %471, %v288_v35  }
 0x1e4   :  { %329 = vperm.xlu1 %472, %v288_v35  }
 0x1eb   :  { %473 = vset.pattern.permute.xlu2 %v333_v8  ;;  %482 = vset.pattern.permute.xlu0 %v333_v8 }
 0x1ec   :  { %474 = vset.pattern.permute.xlu1 %v290_v62 }
 0x1f3   :  { %335 = vperm.xlu2 %473, %v288_v35  }
 0x1f4   :  { %342 = vperm.xlu1 %474, %v337_v49  }
 0x1fb   :  { %476 = vset.pattern.permute.xlu2 %v303_v26 }
 0x1fc   :  { %477 = vset.pattern.permute.xlu1 %v309_v33 }
 0x203   :  { %354 = vperm.xlu2 %476, %v337_v49  }
 0x204   :  { %360 = vperm.xlu1 %477, %v337_v49  }
 0x20b   :  { %478 = vset.pattern.permute.xlu2 %v315_v34 }
 0x20c   :  { %479 = vset.pattern.permute.xlu1 %v321_v54 }
 0x213   :  { %366 = vperm.xlu2 %478, %v337_v49  }
 0x214   :  { %372 = vperm.xlu1 %479, %v337_v49  }
 0x21b   :  { %481 = vset.pattern.permute.xlu2 %v333_v8 }
 0x21d   :  { %v300_v48 = vpop.permute.xlu2 %299 }
 0x21e   :  { %v388_v53 = vmul.f32 %v300_v48, %v559_v11  ;;  %v389_v24 = vmul.f32 %v300_v48, %v564_v12 }
 0x220   :  { %420 = vst [vmem:[%s918_s3 + $0x10] sm:$0xff] %v388_v53 }
 0x221   :  { %421 = vst [vmem:[%s918_s3 + $0x18] sm:$0xff] %v389_v24 }
 0x223   :  { %384 = vperm.xlu2 %481, %v337_v49  }
 0x22d   :  { %v312_v44 = vpop.permute.xlu2 %311 }
 0x22e   :  { %v392_v55 = vmul.f32 %v312_v44, %v595_v20  ;;  %v393_v57 = vmul.f32 %v312_v44, %v600_v21 }
 0x230   :  { %424 = vst [vmem:[%s918_s3 + $0x30] sm:$0xff] %v392_v55 }
 0x231   :  { %425 = vst [vmem:[%s918_s3 + $0x38] sm:$0xff] %v393_v57 }
 0x235   :  { %v306_v11 = vpop.permute.xlu0 %305 }
 0x236   :  { %v390_v12 = vmul.f32 %v306_v11, %v535_v5  ;;  %v391_v56 = vmul.f32 %v306_v11, %v540_v6  ;;  %v294_v43 = vpop.permute.xlu1 %293 }
 0x237   :  { %v386_v62 = vmul.f32 %v294_v43, %v523_v2  ;;  %v387_v20 = vmul.f32 %v294_v43, %v530_v4 }
 0x238   :  { %422 = vst [vmem:[%s918_s3 + $0x20] sm:$0xff] %v390_v12 }
 0x239   :  { %423 = vst [vmem:[%s918_s3 + $0x28] sm:$0xff] %v391_v56 }
 0x23a   :  { %418 = vst [vmem:[%s918_s3] sm:$0xff] %v386_v62 }
 0x23b   :  { %419 = vst [vmem:[%s918_s3 + $0x8] sm:$0xff] %v387_v20 }
 0x23d   :  { %v324_v5 = vpop.permute.xlu2 %323 }
 0x23e   :  { %v396_v2 = vmul.f32 %v324_v5, %v621_v27  ;;  %v397_v4 = vmul.f32 %v324_v5, %v626_v28 }
 0x240   :  { %428 = vst [vmem:[%s918_s3 + $0x50] sm:$0xff] %v396_v2 }
 0x241   :  { %429 = vst [vmem:[%s918_s3 + $0x58] sm:$0xff] %v397_v4 }
 0x245   :  { %v349_v6 = vpop.permute.xlu0 %348 }
 0x246   :  { %v404_v21 = vmul.f32 %v349_v6, %v549_v9  ;;  %v405_v26 = vmul.f32 %v349_v6, %v554_v10  ;;  %v318_v3 = vpop.permute.xlu1 %317 }
 0x247   :  { %v394_v42 = vmul.f32 %v318_v3, %v605_v22  ;;  %v395_v27 = vmul.f32 %v318_v3, %v610_v23 }
 0x248   :  { %436 = vst [vmem:[%s918_s3 + $0x90] sm:$0xff] %v404_v21 }
 0x249   :  { %437 = vst [vmem:[%s918_s3 + $0x98] sm:$0xff] %v405_v26 }
 0x24a   :  { %426 = vst [vmem:[%s918_s3 + $0x40] sm:$0xff] %v394_v42 }
 0x24b   :  { %427 = vst [vmem:[%s918_s3 + $0x48] sm:$0xff] %v395_v27 }
 0x24d   :  { %v336_v9 = vpop.permute.xlu2 %335 }
 0x24e   :  { %v400_v10 = vmul.f32 %v336_v9, %v677_v40  ;;  %v401_v22 = vmul.f32 %v336_v9, %v682_v41 }
 0x250   :  { %432 = vst [vmem:[%s918_s3 + $0x70] sm:$0xff] %v400_v10 }
 0x251   :  { %433 = vst [vmem:[%s918_s3 + $0x78] sm:$0xff] %v401_v22 }
 0x255   :  { %v379_v23 = vpop.permute.xlu0 %378 }
 0x256   :  { %v414_v28 = vmul.f32 %v379_v23, %v657_v36  ;;  %v415_v60 = vmul.f32 %v379_v23, %v662_v37  ;;  %v330_v7 = vpop.permute.xlu1 %329 }
 0x257   :  { %v398_v59 = vmul.f32 %v330_v7, %v667_v38  ;;  %v399_v40 = vmul.f32 %v330_v7, %v672_v39 }
 0x258   :  { %446 = vst [vmem:[%s918_s3 + $0xe0] sm:$0xff] %v414_v28 }
 0x259   :  { %447 = vst [vmem:[%s918_s3 + $0xe8] sm:$0xff] %v415_v60 }
 0x25a   :  { %430 = vst [vmem:[%s918_s3 + $0x60] sm:$0xff] %v398_v59 }
 0x25b   :  { %431 = vst [vmem:[%s918_s3 + $0x68] sm:$0xff] %v399_v40 }
 0x25d   :  { %v355_v36 = vpop.permute.xlu2 %354 }
 0x25e   :  { %v406_v37 = vmul.f32 %v355_v36, %v569_v13  ;;  %v407_v38 = vmul.f32 %v355_v36, %v574_v14 }
 0x260   :  { %438 = vst [vmem:[%s918_s3 + $0xa0] sm:$0xff] %v406_v37 }
 0x261   :  { %439 = vst [vmem:[%s918_s3 + $0xa8] sm:$0xff] %v407_v38 }
 0x266   :  { %v343_v39 = vpop.permute.xlu1 %342 }
 0x267   :  { %v402_v41 = vmul.f32 %v343_v39, %v513_v0  ;;  %v403_v50 = vmul.f32 %v343_v39, %v518_v1 }
 0x269   :  { %434 = vst [vmem:[%s918_s3 + $0x80] sm:$0xff] %v402_v41 }
 0x26a   :  { %435 = vst [vmem:[%s918_s3 + $0x88] sm:$0xff] %v403_v50 }
 0x26d   :  { %v367_v13 = vpop.permute.xlu2 %366 }
 0x26e   :  { %v410_v14 = vmul.f32 %v367_v13, %v631_v29  ;;  %v411_v17 = vmul.f32 %v367_v13, %v636_v30 }
 0x270   :  { %442 = vst [vmem:[%s918_s3 + $0xc0] sm:$0xff] %v410_v14 }
 0x271   :  { %443 = vst [vmem:[%s918_s3 + $0xc8] sm:$0xff] %v411_v17 }
 0x276   :  { %v361_v0 = vpop.permute.xlu1 %360 }
 0x277   :  { %v408_v1 = vmul.f32 %v361_v0, %v585_v18  ;;  %v409_v63 = vmul.f32 %v361_v0, %v590_v19 }
 0x279   :  { %440 = vst [vmem:[%s918_s3 + $0xb0] sm:$0xff] %v408_v1 }
 0x27a   :  { %441 = vst [vmem:[%s918_s3 + $0xb8] sm:$0xff] %v409_v63 }
 0x27d   :  { %v385_v29 = vpop.permute.xlu2 %384 }
 0x27e   :  { %v416_v30 = vmul.f32 %v385_v29, %v693_v45  ;;  %v417_v47 = vmul.f32 %v385_v29, %v698_v46 }
 0x280   :  { %448 = vst [vmem:[%s918_s3 + $0xf0] sm:$0xff] %v416_v30 }
 0x281   :  { %449 = vst [vmem:[%s918_s3 + $0xf8] sm:$0xff] %v417_v47 }
 0x286   :  { %v373_v18 = vpop.permute.xlu1 %372 }
 0x287   :  { %v412_v19 = vmul.f32 %v373_v18, %v641_v31  ;;  %v413_v51 = vmul.f32 %v373_v18, %v646_v32 }
 0x289   :  { %444 = vst [vmem:[%s918_s3 + $0xd0] sm:$0xff] %v412_v19 }
 0x28a   :  { %445 = vst [vmem:[%s918_s3 + $0xd8] sm:$0xff] %v413_v51 }

</bundles_post_ra>
